<compile_context>
chip_gen: v6e
topology: v6e:2x2x1
jax: 0.10.0
libtpu: 0.0.40
codegen_flags: <defaults>
</compile_context>

<pallas_src>
import functools

import jax
import jax.numpy as jnp
from jax import lax
from jax.experimental import pallas as pl
from jax.experimental.pallas import tpu as pltpu


# ------------------------------ Pallas kernel -------------------------------
def _fused_mha_kernel(q_ref, k_ref, v_ref,
                      wq_ref, wk_ref, wv_ref,
                      bq_ref, bk_ref, bv_ref,
                      wo_ref, bo_ref,
                      out_ref, attnw_ref,
                      o_scratch,
                      *, num_heads, batch, seq_q, seq_k):
    H, B, S, Sk = num_heads, batch, seq_q, seq_k
    E = q_ref.shape[-1]
    Dh = E // H
    scale = 1.0 / (Dh ** 0.5)
    inv_h = 1.0 / H

    # In-projections: one MXU dot per Q/K/V covering all batches & heads.
    q = jnp.dot(q_ref[...], wq_ref[...], preferred_element_type=jnp.float32) + bq_ref[...]
    q = q * scale                                   # hoisted: single (B*S,E) VPU mul
    k = jnp.dot(k_ref[...], wk_ref[...], preferred_element_type=jnp.float32) + bk_ref[...]
    v = jnp.dot(v_ref[...], wv_ref[...], preferred_element_type=jnp.float32) + bv_ref[...]

    # B*H == 8: fully-unrolled static loops, no grid / no per-step overhead.
    attn_rows = []
    for b in range(B):
        q_b = q[b * S:(b + 1) * S, :]               # (S, E)
        k_b = k[b * Sk:(b + 1) * Sk, :]             # (Sk, E)
        v_b = v[b * Sk:(b + 1) * Sk, :]             # (Sk, E)

        w_sum = jnp.zeros((S, Sk), jnp.float32)     # head-summed attn weights
        for h in range(H):
            sl = slice(h * Dh, (h + 1) * Dh)
            # NT contraction (contract last dim of both) -> no explicit K^T.
            s = lax.dot_general(q_b[:, sl], k_b[:, sl], (((1,), (1,)), ((), ())),
                                preferred_element_type=jnp.float32)   # (S, Sk)
            m = jnp.max(s, axis=-1, keepdims=True)
            p = jnp.exp(s - m)
            denom = jnp.sum(p, axis=-1, keepdims=True)
            w = p / denom                            # exact softmax (matches PyTorch)
            w_sum = w_sum + w

            o_bh = jnp.dot(w, v_b[:, sl], preferred_element_type=jnp.float32)  # (S, Dh)
            # Stash per-head output at its lane offset; stores ride idle vst
            # slots while the MXU is busy with the next head's dots.
            o_scratch[b * S:(b + 1) * S, sl] = o_bh

        attn_rows.append(w_sum * inv_h)

    # ONE output-projection dot over the whole (B*S, E) slab + single store.
    out_ref[...] = (jnp.dot(o_scratch[...], wo_ref[...],
                            preferred_element_type=jnp.float32)
                    + bo_ref[...]).astype(out_ref.dtype)
    # Single store of the head-averaged attention weights.
    attnw_ref[...] = jnp.stack(attn_rows, axis=0).astype(attnw_ref.dtype)


# ------------------------------ Model wrapper --------------------------------
def mha_forward(query, key, value, params, num_heads):
    """Replicates nn.MultiheadAttention forward (no masks, dropout=0).

    query/key/value: (S, B, E).  Returns (output (S, B, E),
    attn_weights (B, S, Sk)) with weights averaged over heads (PyTorch default
    need_weights=True, average_attn_weights=True).
    """
    S, B, E = query.shape
    Sk = key.shape[0]

    # (S, B, E) -> (B*S, E): batch-major rows so the kernel's per-batch slices
    # are contiguous, sublane-aligned row blocks.  (Trivial at these shapes; at
    # large S*B*E feed (S,B,E) directly / make batch a grid axis instead.)
    q2 = query.transpose(1, 0, 2).reshape(B * S, E)
    k2 = key.transpose(1, 0, 2).reshape(B * Sk, E)
    v2 = value.transpose(1, 0, 2).reshape(B * Sk, E)

    ipw = params["in_proj_weight"]           # (3E, E)
    ipb = params["in_proj_bias"]             # (3E,)
    wq_t = ipw[:E].T
    wk_t = ipw[E:2 * E].T
    wv_t = ipw[2 * E:].T
    bq = ipb[:E].reshape(1, E)
    bk = ipb[E:2 * E].reshape(1, E)
    bv = ipb[2 * E:].reshape(1, E)
    wo_t = params["out_proj_weight"].T       # (E, E)
    bo = params["out_proj_bias"].reshape(1, E)

    kernel = functools.partial(_fused_mha_kernel, num_heads=num_heads,
                               batch=B, seq_q=S, seq_k=Sk)
    out2, attn_weights = pl.pallas_call(
        kernel,
        out_shape=(
            jax.ShapeDtypeStruct((B * S, E), query.dtype),
            jax.ShapeDtypeStruct((B, S, Sk), jnp.float32),
        ),
        scratch_shapes=[pltpu.VMEM((B * S, E), jnp.float32)],
    )(q2, k2, v2, wq_t, wk_t, wv_t, bq, bk, bv, wo_t, bo)

    output = out2.reshape(B, S, E).transpose(1, 0, 2)   # back to (S, B, E)
    return output, attn_weights


def init_params(key, embed_dim):
    k1, k2, k3, k4 = jax.random.split(key, 4)
    scale = 1.0 / (embed_dim ** 0.5)
    return {
        "in_proj_weight": jax.random.normal(k1, (3 * embed_dim, embed_dim), jnp.float32) * scale,
        "in_proj_bias": jax.random.normal(k2, (3 * embed_dim,), jnp.float32) * 0.01,
        "out_proj_weight": jax.random.normal(k3, (embed_dim, embed_dim), jnp.float32) * scale,
        "out_proj_bias": jax.random.normal(k4, (embed_dim,), jnp.float32) * 0.01,
    }


if __name__ == "__main__":
    # TODO(synk): key_padding_mask / attn_mask are optional args in the PyTorch
    # module and are not supported here (forward is exercised without them).
    EMBED_DIM, NUM_HEADS = 64, 4
    SEQ, BATCH = 8, 2

    root = jax.random.PRNGKey(0)
    kp, kq, kk, kv = jax.random.split(root, 4)
    params = init_params(kp, EMBED_DIM)

    query = jax.random.normal(kq, (SEQ, BATCH, EMBED_DIM), jnp.float32)
    key = jax.random.normal(kk, (SEQ, BATCH, EMBED_DIM), jnp.float32)
    value = jax.random.normal(kv, (SEQ, BATCH, EMBED_DIM), jnp.float32)

    fwd = jax.jit(functools.partial(mha_forward, num_heads=NUM_HEADS))
    output, attn_weights = fwd(query, key, value, params)
    jax.block_until_ready((output, attn_weights))

    assert output.shape == (SEQ, BATCH, EMBED_DIM)
    assert attn_weights.shape == (BATCH, SEQ, SEQ)
    print("KERNEL_OK")
</pallas_src>

<mosaic_0001>
module attributes {stable_mosaic.version = 11 : i64} {
  func.func @_fused_mha_kernel(%arg0: memref<16x64xf32, #tpu.memory_space<vmem>>, %arg1: memref<16x64xf32, #tpu.memory_space<vmem>>, %arg2: memref<16x64xf32, #tpu.memory_space<vmem>>, %arg3: memref<64x64xf32, #tpu.memory_space<vmem>>, %arg4: memref<64x64xf32, #tpu.memory_space<vmem>>, %arg5: memref<64x64xf32, #tpu.memory_space<vmem>>, %arg6: memref<1x64xf32, #tpu.memory_space<vmem>>, %arg7: memref<1x64xf32, #tpu.memory_space<vmem>>, %arg8: memref<1x64xf32, #tpu.memory_space<vmem>>, %arg9: memref<64x64xf32, #tpu.memory_space<vmem>>, %arg10: memref<1x64xf32, #tpu.memory_space<vmem>>, %arg11: memref<16x64xf32, #tpu.memory_space<vmem>>, %arg12: memref<2x8x8xf32, #tpu.memory_space<vmem>>, %arg13: memref<16x64xf32, #tpu.memory_space<vmem>>) attributes {dimension_semantics = [], scalar_prefetch = 0 : i64, scratch_operands = 1 : i64, tpu.core_type = #tpu.core_type<tc>} {
    %c0 = arith.constant 0 : index
    %c0_0 = arith.constant 0 : index
    %0 = vector.load %arg0[%c0, %c0_0] : memref<16x64xf32, #tpu.memory_space<vmem>>, vector<16x64xf32>
    %c0_1 = arith.constant 0 : index
    %c0_2 = arith.constant 0 : index
    %1 = vector.load %arg3[%c0_1, %c0_2] : memref<64x64xf32, #tpu.memory_space<vmem>>, vector<64x64xf32>
    %cst = arith.constant dense<0.000000e+00> : vector<16x64xf32>
    %2 = tpu.matmul %0, %1, %cst {dimension_numbers = #tpu.dot_dimension_numbers<[1], [0], [0], [1], [0, 0, 1, 1], [], []>} : vector<16x64xf32>, vector<64x64xf32>, vector<16x64xf32> -> vector<16x64xf32>
    %c0_3 = arith.constant 0 : index
    %c0_4 = arith.constant 0 : index
    %3 = vector.load %arg6[%c0_3, %c0_4] : memref<1x64xf32, #tpu.memory_space<vmem>>, vector<1x64xf32>
    %4 = vector.broadcast %3 : vector<1x64xf32> to vector<16x64xf32>
    %5 = arith.addf %2, %4 : vector<16x64xf32>
    %cst_5 = arith.constant 2.500000e-01 : f32
    %6 = vector.broadcast %cst_5 : f32 to vector<16x64xf32>
    %7 = arith.mulf %5, %6 : vector<16x64xf32>
    %c0_6 = arith.constant 0 : index
    %c0_7 = arith.constant 0 : index
    %8 = vector.load %arg1[%c0_6, %c0_7] : memref<16x64xf32, #tpu.memory_space<vmem>>, vector<16x64xf32>
    %c0_8 = arith.constant 0 : index
    %c0_9 = arith.constant 0 : index
    %9 = vector.load %arg4[%c0_8, %c0_9] : memref<64x64xf32, #tpu.memory_space<vmem>>, vector<64x64xf32>
    %cst_10 = arith.constant dense<0.000000e+00> : vector<16x64xf32>
    %10 = tpu.matmul %8, %9, %cst_10 {dimension_numbers = #tpu.dot_dimension_numbers<[1], [0], [0], [1], [0, 0, 1, 1], [], []>} : vector<16x64xf32>, vector<64x64xf32>, vector<16x64xf32> -> vector<16x64xf32>
    %c0_11 = arith.constant 0 : index
    %c0_12 = arith.constant 0 : index
    %11 = vector.load %arg7[%c0_11, %c0_12] : memref<1x64xf32, #tpu.memory_space<vmem>>, vector<1x64xf32>
    %12 = vector.broadcast %11 : vector<1x64xf32> to vector<16x64xf32>
    %13 = arith.addf %10, %12 : vector<16x64xf32>
    %c0_13 = arith.constant 0 : index
    %c0_14 = arith.constant 0 : index
    %14 = vector.load %arg2[%c0_13, %c0_14] : memref<16x64xf32, #tpu.memory_space<vmem>>, vector<16x64xf32>
    %c0_15 = arith.constant 0 : index
    %c0_16 = arith.constant 0 : index
    %15 = vector.load %arg5[%c0_15, %c0_16] : memref<64x64xf32, #tpu.memory_space<vmem>>, vector<64x64xf32>
    %cst_17 = arith.constant dense<0.000000e+00> : vector<16x64xf32>
    %16 = tpu.matmul %14, %15, %cst_17 {dimension_numbers = #tpu.dot_dimension_numbers<[1], [0], [0], [1], [0, 0, 1, 1], [], []>} : vector<16x64xf32>, vector<64x64xf32>, vector<16x64xf32> -> vector<16x64xf32>
    %c0_18 = arith.constant 0 : index
    %c0_19 = arith.constant 0 : index
    %17 = vector.load %arg8[%c0_18, %c0_19] : memref<1x64xf32, #tpu.memory_space<vmem>>, vector<1x64xf32>
    %18 = vector.broadcast %17 : vector<1x64xf32> to vector<16x64xf32>
    %19 = arith.addf %16, %18 : vector<16x64xf32>
    %20 = vector.extract_strided_slice %7 {offsets = [0, 0], sizes = [8, 64], strides = [1, 1]} : vector<16x64xf32> to vector<8x64xf32>
    %21 = vector.extract_strided_slice %13 {offsets = [0, 0], sizes = [8, 64], strides = [1, 1]} : vector<16x64xf32> to vector<8x64xf32>
    %22 = vector.extract_strided_slice %19 {offsets = [0, 0], sizes = [8, 64], strides = [1, 1]} : vector<16x64xf32> to vector<8x64xf32>
    %cst_20 = arith.constant 0.000000e+00 : f32
    %23 = vector.broadcast %cst_20 : f32 to vector<8x8xf32>
    %24 = vector.extract_strided_slice %20 {offsets = [0, 0], sizes = [8, 16], strides = [1, 1]} : vector<8x64xf32> to vector<8x16xf32>
    %25 = vector.extract_strided_slice %21 {offsets = [0, 0], sizes = [8, 16], strides = [1, 1]} : vector<8x64xf32> to vector<8x16xf32>
    %cst_21 = arith.constant dense<0.000000e+00> : vector<8x8xf32>
    %26 = tpu.matmul %24, %25, %cst_21 {dimension_numbers = #tpu.dot_dimension_numbers<[1], [1], [0], [0], [0, 0, 1, 0], [], []>} : vector<8x16xf32>, vector<8x16xf32>, vector<8x8xf32> -> vector<8x8xf32>
    %cst_22 = arith.constant dense<0xFF800000> : vector<8xf32>
    %27 = vector.multi_reduction <maximumf>, %26, %cst_22 [1] : vector<8x8xf32> to vector<8xf32>
    %28 = vector.shape_cast %27 : vector<8xf32> to vector<8x1xf32>
    %29 = vector.broadcast %28 : vector<8x1xf32> to vector<8x8xf32>
    %30 = arith.subf %26, %29 : vector<8x8xf32>
    %31 = math.exp %30 : vector<8x8xf32>
    %cst_23 = arith.constant dense<0.000000e+00> : vector<8xf32>
    %32 = vector.multi_reduction <add>, %31, %cst_23 [1] : vector<8x8xf32> to vector<8xf32>
    %33 = vector.shape_cast %32 : vector<8xf32> to vector<8x1xf32>
    %34 = vector.broadcast %33 : vector<8x1xf32> to vector<8x8xf32>
    %35 = arith.divf %31, %34 : vector<8x8xf32>
    %36 = arith.addf %23, %35 : vector<8x8xf32>
    %37 = vector.extract_strided_slice %22 {offsets = [0, 0], sizes = [8, 16], strides = [1, 1]} : vector<8x64xf32> to vector<8x16xf32>
    %cst_24 = arith.constant dense<0.000000e+00> : vector<8x16xf32>
    %38 = tpu.matmul %35, %37, %cst_24 {dimension_numbers = #tpu.dot_dimension_numbers<[1], [0], [0], [1], [0, 0, 1, 1], [], []>} : vector<8x8xf32>, vector<8x16xf32>, vector<8x16xf32> -> vector<8x16xf32>
    %c0_25 = arith.constant 0 : index
    %c0_26 = arith.constant 0 : index
    %39 = vector.load %arg13[%c0_25, %c0_26] : memref<16x64xf32, #tpu.memory_space<vmem>>, vector<8x16xf32>
    tpu.vector_store %arg13[%c0_25, %c0_26], %38 {strides = array<i32>} : memref<16x64xf32, #tpu.memory_space<vmem>>, vector<8x16xf32>,
    %40 = vector.extract_strided_slice %20 {offsets = [0, 16], sizes = [8, 16], strides = [1, 1]} : vector<8x64xf32> to vector<8x16xf32>
    %41 = vector.extract_strided_slice %21 {offsets = [0, 16], sizes = [8, 16], strides = [1, 1]} : vector<8x64xf32> to vector<8x16xf32>
    %cst_27 = arith.constant dense<0.000000e+00> : vector<8x8xf32>
    %42 = tpu.matmul %40, %41, %cst_27 {dimension_numbers = #tpu.dot_dimension_numbers<[1], [1], [0], [0], [0, 0, 1, 0], [], []>} : vector<8x16xf32>, vector<8x16xf32>, vector<8x8xf32> -> vector<8x8xf32>
    %cst_28 = arith.constant dense<0xFF800000> : vector<8xf32>
    %43 = vector.multi_reduction <maximumf>, %42, %cst_28 [1] : vector<8x8xf32> to vector<8xf32>
    %44 = vector.shape_cast %43 : vector<8xf32> to vector<8x1xf32>
    %45 = vector.broadcast %44 : vector<8x1xf32> to vector<8x8xf32>
    %46 = arith.subf %42, %45 : vector<8x8xf32>
    %47 = math.exp %46 : vector<8x8xf32>
    %cst_29 = arith.constant dense<0.000000e+00> : vector<8xf32>
    %48 = vector.multi_reduction <add>, %47, %cst_29 [1] : vector<8x8xf32> to vector<8xf32>
    %49 = vector.shape_cast %48 : vector<8xf32> to vector<8x1xf32>
    %50 = vector.broadcast %49 : vector<8x1xf32> to vector<8x8xf32>
    %51 = arith.divf %47, %50 : vector<8x8xf32>
    %52 = arith.addf %36, %51 : vector<8x8xf32>
    %53 = vector.extract_strided_slice %22 {offsets = [0, 16], sizes = [8, 16], strides = [1, 1]} : vector<8x64xf32> to vector<8x16xf32>
    %cst_30 = arith.constant dense<0.000000e+00> : vector<8x16xf32>
    %54 = tpu.matmul %51, %53, %cst_30 {dimension_numbers = #tpu.dot_dimension_numbers<[1], [0], [0], [1], [0, 0, 1, 1], [], []>} : vector<8x8xf32>, vector<8x16xf32>, vector<8x16xf32> -> vector<8x16xf32>
    %c0_31 = arith.constant 0 : index
    %c16 = arith.constant 16 : index
    %55 = vector.load %arg13[%c0_31, %c16] : memref<16x64xf32, #tpu.memory_space<vmem>>, vector<8x16xf32>
    tpu.vector_store %arg13[%c0_31, %c16], %54 {strides = array<i32>} : memref<16x64xf32, #tpu.memory_space<vmem>>, vector<8x16xf32>,
    %56 = vector.extract_strided_slice %20 {offsets = [0, 32], sizes = [8, 16], strides = [1, 1]} : vector<8x64xf32> to vector<8x16xf32>
    %57 = vector.extract_strided_slice %21 {offsets = [0, 32], sizes = [8, 16], strides = [1, 1]} : vector<8x64xf32> to vector<8x16xf32>
    %cst_32 = arith.constant dense<0.000000e+00> : vector<8x8xf32>
    %58 = tpu.matmul %56, %57, %cst_32 {dimension_numbers = #tpu.dot_dimension_numbers<[1], [1], [0], [0], [0, 0, 1, 0], [], []>} : vector<8x16xf32>, vector<8x16xf32>, vector<8x8xf32> -> vector<8x8xf32>
    %cst_33 = arith.constant dense<0xFF800000> : vector<8xf32>
    %59 = vector.multi_reduction <maximumf>, %58, %cst_33 [1] : vector<8x8xf32> to vector<8xf32>
    %60 = vector.shape_cast %59 : vector<8xf32> to vector<8x1xf32>
    %61 = vector.broadcast %60 : vector<8x1xf32> to vector<8x8xf32>
    %62 = arith.subf %58, %61 : vector<8x8xf32>
    %63 = math.exp %62 : vector<8x8xf32>
    %cst_34 = arith.constant dense<0.000000e+00> : vector<8xf32>
    %64 = vector.multi_reduction <add>, %63, %cst_34 [1] : vector<8x8xf32> to vector<8xf32>
    %65 = vector.shape_cast %64 : vector<8xf32> to vector<8x1xf32>
    %66 = vector.broadcast %65 : vector<8x1xf32> to vector<8x8xf32>
    %67 = arith.divf %63, %66 : vector<8x8xf32>
    %68 = arith.addf %52, %67 : vector<8x8xf32>
    %69 = vector.extract_strided_slice %22 {offsets = [0, 32], sizes = [8, 16], strides = [1, 1]} : vector<8x64xf32> to vector<8x16xf32>
    %cst_35 = arith.constant dense<0.000000e+00> : vector<8x16xf32>
    %70 = tpu.matmul %67, %69, %cst_35 {dimension_numbers = #tpu.dot_dimension_numbers<[1], [0], [0], [1], [0, 0, 1, 1], [], []>} : vector<8x8xf32>, vector<8x16xf32>, vector<8x16xf32> -> vector<8x16xf32>
    %c0_36 = arith.constant 0 : index
    %c32 = arith.constant 32 : index
    %71 = vector.load %arg13[%c0_36, %c32] : memref<16x64xf32, #tpu.memory_space<vmem>>, vector<8x16xf32>
    tpu.vector_store %arg13[%c0_36, %c32], %70 {strides = array<i32>} : memref<16x64xf32, #tpu.memory_space<vmem>>, vector<8x16xf32>,
    %72 = vector.extract_strided_slice %20 {offsets = [0, 48], sizes = [8, 16], strides = [1, 1]} : vector<8x64xf32> to vector<8x16xf32>
    %73 = vector.extract_strided_slice %21 {offsets = [0, 48], sizes = [8, 16], strides = [1, 1]} : vector<8x64xf32> to vector<8x16xf32>
    %cst_37 = arith.constant dense<0.000000e+00> : vector<8x8xf32>
    %74 = tpu.matmul %72, %73, %cst_37 {dimension_numbers = #tpu.dot_dimension_numbers<[1], [1], [0], [0], [0, 0, 1, 0], [], []>} : vector<8x16xf32>, vector<8x16xf32>, vector<8x8xf32> -> vector<8x8xf32>
    %cst_38 = arith.constant dense<0xFF800000> : vector<8xf32>
    %75 = vector.multi_reduction <maximumf>, %74, %cst_38 [1] : vector<8x8xf32> to vector<8xf32>
    %76 = vector.shape_cast %75 : vector<8xf32> to vector<8x1xf32>
    %77 = vector.broadcast %76 : vector<8x1xf32> to vector<8x8xf32>
    %78 = arith.subf %74, %77 : vector<8x8xf32>
    %79 = math.exp %78 : vector<8x8xf32>
    %cst_39 = arith.constant dense<0.000000e+00> : vector<8xf32>
    %80 = vector.multi_reduction <add>, %79, %cst_39 [1] : vector<8x8xf32> to vector<8xf32>
    %81 = vector.shape_cast %80 : vector<8xf32> to vector<8x1xf32>
    %82 = vector.broadcast %81 : vector<8x1xf32> to vector<8x8xf32>
    %83 = arith.divf %79, %82 : vector<8x8xf32>
    %84 = arith.addf %68, %83 : vector<8x8xf32>
    %85 = vector.extract_strided_slice %22 {offsets = [0, 48], sizes = [8, 16], strides = [1, 1]} : vector<8x64xf32> to vector<8x16xf32>
    %cst_40 = arith.constant dense<0.000000e+00> : vector<8x16xf32>
    %86 = tpu.matmul %83, %85, %cst_40 {dimension_numbers = #tpu.dot_dimension_numbers<[1], [0], [0], [1], [0, 0, 1, 1], [], []>} : vector<8x8xf32>, vector<8x16xf32>, vector<8x16xf32> -> vector<8x16xf32>
    %c0_41 = arith.constant 0 : index
    %c48 = arith.constant 48 : index
    %87 = vector.load %arg13[%c0_41, %c48] : memref<16x64xf32, #tpu.memory_space<vmem>>, vector<8x16xf32>
    tpu.vector_store %arg13[%c0_41, %c48], %86 {strides = array<i32>} : memref<16x64xf32, #tpu.memory_space<vmem>>, vector<8x16xf32>,
    %cst_42 = arith.constant 2.500000e-01 : f32
    %88 = vector.broadcast %cst_42 : f32 to vector<8x8xf32>
    %89 = arith.mulf %84, %88 : vector<8x8xf32>
    %90 = vector.extract_strided_slice %7 {offsets = [8, 0], sizes = [8, 64], strides = [1, 1]} : vector<16x64xf32> to vector<8x64xf32>
    %91 = vector.extract_strided_slice %13 {offsets = [8, 0], sizes = [8, 64], strides = [1, 1]} : vector<16x64xf32> to vector<8x64xf32>
    %92 = vector.extract_strided_slice %19 {offsets = [8, 0], sizes = [8, 64], strides = [1, 1]} : vector<16x64xf32> to vector<8x64xf32>
    %cst_43 = arith.constant 0.000000e+00 : f32
    %93 = vector.broadcast %cst_43 : f32 to vector<8x8xf32>
    %94 = vector.extract_strided_slice %90 {offsets = [0, 0], sizes = [8, 16], strides = [1, 1]} : vector<8x64xf32> to vector<8x16xf32>
    %95 = vector.extract_strided_slice %91 {offsets = [0, 0], sizes = [8, 16], strides = [1, 1]} : vector<8x64xf32> to vector<8x16xf32>
    %cst_44 = arith.constant dense<0.000000e+00> : vector<8x8xf32>
    %96 = tpu.matmul %94, %95, %cst_44 {dimension_numbers = #tpu.dot_dimension_numbers<[1], [1], [0], [0], [0, 0, 1, 0], [], []>} : vector<8x16xf32>, vector<8x16xf32>, vector<8x8xf32> -> vector<8x8xf32>
    %cst_45 = arith.constant dense<0xFF800000> : vector<8xf32>
    %97 = vector.multi_reduction <maximumf>, %96, %cst_45 [1] : vector<8x8xf32> to vector<8xf32>
    %98 = vector.shape_cast %97 : vector<8xf32> to vector<8x1xf32>
    %99 = vector.broadcast %98 : vector<8x1xf32> to vector<8x8xf32>
    %100 = arith.subf %96, %99 : vector<8x8xf32>
    %101 = math.exp %100 : vector<8x8xf32>
    %cst_46 = arith.constant dense<0.000000e+00> : vector<8xf32>
    %102 = vector.multi_reduction <add>, %101, %cst_46 [1] : vector<8x8xf32> to vector<8xf32>
    %103 = vector.shape_cast %102 : vector<8xf32> to vector<8x1xf32>
    %104 = vector.broadcast %103 : vector<8x1xf32> to vector<8x8xf32>
    %105 = arith.divf %101, %104 : vector<8x8xf32>
    %106 = arith.addf %93, %105 : vector<8x8xf32>
    %107 = vector.extract_strided_slice %92 {offsets = [0, 0], sizes = [8, 16], strides = [1, 1]} : vector<8x64xf32> to vector<8x16xf32>
    %cst_47 = arith.constant dense<0.000000e+00> : vector<8x16xf32>
    %108 = tpu.matmul %105, %107, %cst_47 {dimension_numbers = #tpu.dot_dimension_numbers<[1], [0], [0], [1], [0, 0, 1, 1], [], []>} : vector<8x8xf32>, vector<8x16xf32>, vector<8x16xf32> -> vector<8x16xf32>
    %c8 = arith.constant 8 : index
    %c0_48 = arith.constant 0 : index
    %109 = vector.load %arg13[%c8, %c0_48] : memref<16x64xf32, #tpu.memory_space<vmem>>, vector<8x16xf32>
    tpu.vector_store %arg13[%c8, %c0_48], %108 {strides = array<i32>} : memref<16x64xf32, #tpu.memory_space<vmem>>, vector<8x16xf32>,
    %110 = vector.extract_strided_slice %90 {offsets = [0, 16], sizes = [8, 16], strides = [1, 1]} : vector<8x64xf32> to vector<8x16xf32>
    %111 = vector.extract_strided_slice %91 {offsets = [0, 16], sizes = [8, 16], strides = [1, 1]} : vector<8x64xf32> to vector<8x16xf32>
    %cst_49 = arith.constant dense<0.000000e+00> : vector<8x8xf32>
    %112 = tpu.matmul %110, %111, %cst_49 {dimension_numbers = #tpu.dot_dimension_numbers<[1], [1], [0], [0], [0, 0, 1, 0], [], []>} : vector<8x16xf32>, vector<8x16xf32>, vector<8x8xf32> -> vector<8x8xf32>
    %cst_50 = arith.constant dense<0xFF800000> : vector<8xf32>
    %113 = vector.multi_reduction <maximumf>, %112, %cst_50 [1] : vector<8x8xf32> to vector<8xf32>
    %114 = vector.shape_cast %113 : vector<8xf32> to vector<8x1xf32>
    %115 = vector.broadcast %114 : vector<8x1xf32> to vector<8x8xf32>
    %116 = arith.subf %112, %115 : vector<8x8xf32>
    %117 = math.exp %116 : vector<8x8xf32>
    %cst_51 = arith.constant dense<0.000000e+00> : vector<8xf32>
    %118 = vector.multi_reduction <add>, %117, %cst_51 [1] : vector<8x8xf32> to vector<8xf32>
    %119 = vector.shape_cast %118 : vector<8xf32> to vector<8x1xf32>
    %120 = vector.broadcast %119 : vector<8x1xf32> to vector<8x8xf32>
    %121 = arith.divf %117, %120 : vector<8x8xf32>
    %122 = arith.addf %106, %121 : vector<8x8xf32>
    %123 = vector.extract_strided_slice %92 {offsets = [0, 16], sizes = [8, 16], strides = [1, 1]} : vector<8x64xf32> to vector<8x16xf32>
    %cst_52 = arith.constant dense<0.000000e+00> : vector<8x16xf32>
    %124 = tpu.matmul %121, %123, %cst_52 {dimension_numbers = #tpu.dot_dimension_numbers<[1], [0], [0], [1], [0, 0, 1, 1], [], []>} : vector<8x8xf32>, vector<8x16xf32>, vector<8x16xf32> -> vector<8x16xf32>
    %c8_53 = arith.constant 8 : index
    %c16_54 = arith.constant 16 : index
    %125 = vector.load %arg13[%c8_53, %c16_54] : memref<16x64xf32, #tpu.memory_space<vmem>>, vector<8x16xf32>
    tpu.vector_store %arg13[%c8_53, %c16_54], %124 {strides = array<i32>} : memref<16x64xf32, #tpu.memory_space<vmem>>, vector<8x16xf32>,
    %126 = vector.extract_strided_slice %90 {offsets = [0, 32], sizes = [8, 16], strides = [1, 1]} : vector<8x64xf32> to vector<8x16xf32>
    %127 = vector.extract_strided_slice %91 {offsets = [0, 32], sizes = [8, 16], strides = [1, 1]} : vector<8x64xf32> to vector<8x16xf32>
    %cst_55 = arith.constant dense<0.000000e+00> : vector<8x8xf32>
    %128 = tpu.matmul %126, %127, %cst_55 {dimension_numbers = #tpu.dot_dimension_numbers<[1], [1], [0], [0], [0, 0, 1, 0], [], []>} : vector<8x16xf32>, vector<8x16xf32>, vector<8x8xf32> -> vector<8x8xf32>
    %cst_56 = arith.constant dense<0xFF800000> : vector<8xf32>
    %129 = vector.multi_reduction <maximumf>, %128, %cst_56 [1] : vector<8x8xf32> to vector<8xf32>
    %130 = vector.shape_cast %129 : vector<8xf32> to vector<8x1xf32>
    %131 = vector.broadcast %130 : vector<8x1xf32> to vector<8x8xf32>
    %132 = arith.subf %128, %131 : vector<8x8xf32>
    %133 = math.exp %132 : vector<8x8xf32>
    %cst_57 = arith.constant dense<0.000000e+00> : vector<8xf32>
    %134 = vector.multi_reduction <add>, %133, %cst_57 [1] : vector<8x8xf32> to vector<8xf32>
    %135 = vector.shape_cast %134 : vector<8xf32> to vector<8x1xf32>
    %136 = vector.broadcast %135 : vector<8x1xf32> to vector<8x8xf32>
    %137 = arith.divf %133, %136 : vector<8x8xf32>
    %138 = arith.addf %122, %137 : vector<8x8xf32>
    %139 = vector.extract_strided_slice %92 {offsets = [0, 32], sizes = [8, 16], strides = [1, 1]} : vector<8x64xf32> to vector<8x16xf32>
    %cst_58 = arith.constant dense<0.000000e+00> : vector<8x16xf32>
    %140 = tpu.matmul %137, %139, %cst_58 {dimension_numbers = #tpu.dot_dimension_numbers<[1], [0], [0], [1], [0, 0, 1, 1], [], []>} : vector<8x8xf32>, vector<8x16xf32>, vector<8x16xf32> -> vector<8x16xf32>
    %c8_59 = arith.constant 8 : index
    %c32_60 = arith.constant 32 : index
    %141 = vector.load %arg13[%c8_59, %c32_60] : memref<16x64xf32, #tpu.memory_space<vmem>>, vector<8x16xf32>
    tpu.vector_store %arg13[%c8_59, %c32_60], %140 {strides = array<i32>} : memref<16x64xf32, #tpu.memory_space<vmem>>, vector<8x16xf32>,
    %142 = vector.extract_strided_slice %90 {offsets = [0, 48], sizes = [8, 16], strides = [1, 1]} : vector<8x64xf32> to vector<8x16xf32>
    %143 = vector.extract_strided_slice %91 {offsets = [0, 48], sizes = [8, 16], strides = [1, 1]} : vector<8x64xf32> to vector<8x16xf32>
    %cst_61 = arith.constant dense<0.000000e+00> : vector<8x8xf32>
    %144 = tpu.matmul %142, %143, %cst_61 {dimension_numbers = #tpu.dot_dimension_numbers<[1], [1], [0], [0], [0, 0, 1, 0], [], []>} : vector<8x16xf32>, vector<8x16xf32>, vector<8x8xf32> -> vector<8x8xf32>
    %cst_62 = arith.constant dense<0xFF800000> : vector<8xf32>
    %145 = vector.multi_reduction <maximumf>, %144, %cst_62 [1] : vector<8x8xf32> to vector<8xf32>
    %146 = vector.shape_cast %145 : vector<8xf32> to vector<8x1xf32>
    %147 = vector.broadcast %146 : vector<8x1xf32> to vector<8x8xf32>
    %148 = arith.subf %144, %147 : vector<8x8xf32>
    %149 = math.exp %148 : vector<8x8xf32>
    %cst_63 = arith.constant dense<0.000000e+00> : vector<8xf32>
    %150 = vector.multi_reduction <add>, %149, %cst_63 [1] : vector<8x8xf32> to vector<8xf32>
    %151 = vector.shape_cast %150 : vector<8xf32> to vector<8x1xf32>
    %152 = vector.broadcast %151 : vector<8x1xf32> to vector<8x8xf32>
    %153 = arith.divf %149, %152 : vector<8x8xf32>
    %154 = arith.addf %138, %153 : vector<8x8xf32>
    %155 = vector.extract_strided_slice %92 {offsets = [0, 48], sizes = [8, 16], strides = [1, 1]} : vector<8x64xf32> to vector<8x16xf32>
    %cst_64 = arith.constant dense<0.000000e+00> : vector<8x16xf32>
    %156 = tpu.matmul %153, %155, %cst_64 {dimension_numbers = #tpu.dot_dimension_numbers<[1], [0], [0], [1], [0, 0, 1, 1], [], []>} : vector<8x8xf32>, vector<8x16xf32>, vector<8x16xf32> -> vector<8x16xf32>
    %c8_65 = arith.constant 8 : index
    %c48_66 = arith.constant 48 : index
    %157 = vector.load %arg13[%c8_65, %c48_66] : memref<16x64xf32, #tpu.memory_space<vmem>>, vector<8x16xf32>
    tpu.vector_store %arg13[%c8_65, %c48_66], %156 {strides = array<i32>} : memref<16x64xf32, #tpu.memory_space<vmem>>, vector<8x16xf32>,
    %cst_67 = arith.constant 2.500000e-01 : f32
    %158 = vector.broadcast %cst_67 : f32 to vector<8x8xf32>
    %159 = arith.mulf %154, %158 : vector<8x8xf32>
    %c0_68 = arith.constant 0 : index
    %c0_69 = arith.constant 0 : index
    %160 = vector.load %arg13[%c0_68, %c0_69] : memref<16x64xf32, #tpu.memory_space<vmem>>, vector<16x64xf32>
    %c0_70 = arith.constant 0 : index
    %c0_71 = arith.constant 0 : index
    %161 = vector.load %arg9[%c0_70, %c0_71] : memref<64x64xf32, #tpu.memory_space<vmem>>, vector<64x64xf32>
    %cst_72 = arith.constant dense<0.000000e+00> : vector<16x64xf32>
    %162 = tpu.matmul %160, %161, %cst_72 {dimension_numbers = #tpu.dot_dimension_numbers<[1], [0], [0], [1], [0, 0, 1, 1], [], []>} : vector<16x64xf32>, vector<64x64xf32>, vector<16x64xf32> -> vector<16x64xf32>
    %c0_73 = arith.constant 0 : index
    %c0_74 = arith.constant 0 : index
    %163 = vector.load %arg10[%c0_73, %c0_74] : memref<1x64xf32, #tpu.memory_space<vmem>>, vector<1x64xf32>
    %164 = vector.broadcast %163 : vector<1x64xf32> to vector<16x64xf32>
    %165 = arith.addf %162, %164 : vector<16x64xf32>
    %c0_75 = arith.constant 0 : index
    %c0_76 = arith.constant 0 : index
    %166 = vector.load %arg11[%c0_75, %c0_76] : memref<16x64xf32, #tpu.memory_space<vmem>>, vector<16x64xf32>
    tpu.vector_store %arg11[%c0_75, %c0_76], %165 {strides = array<i32>} : memref<16x64xf32, #tpu.memory_space<vmem>>, vector<16x64xf32>,
    %167 = vector.shape_cast %89 : vector<8x8xf32> to vector<1x8x8xf32>
    %168 = vector.shape_cast %159 : vector<8x8xf32> to vector<1x8x8xf32>
    %169 = tpu.concatenate %167, %168 in 0 : vector<1x8x8xf32>, vector<1x8x8xf32> -> vector<2x8x8xf32>
    %c0_77 = arith.constant 0 : index
    %c0_78 = arith.constant 0 : index
    %c0_79 = arith.constant 0 : index
    %170 = vector.load %arg12[%c0_77, %c0_78, %c0_79] : memref<2x8x8xf32, #tpu.memory_space<vmem>>, vector<2x8x8xf32>
    tpu.vector_store %arg12[%c0_77, %c0_78, %c0_79], %169 {strides = array<i32>} : memref<2x8x8xf32, #tpu.memory_space<vmem>>, vector<2x8x8xf32>,
    return
  }
}

</mosaic_0001>

<bundles_post_ra>
// kernel: mha_forward.1
= control target key start
LH: loop header
LB: loop body
LE: loop exit
PB: predicated region body
PF: predicated region fallthrough
CT: control target
= control target key end

     0   :  { %s2541_s0 = inlined_call_operand.vmem [shape: f32[16,64], index: 0, kind: input, shape index: {}]   ;;  %s2542_s1 = inlined_call_operand.vmem [shape: f32[16,64], index: 1, kind: input, shape index: {}]   ;;  %s2543_s2 = inlined_call_operand.vmem [shape: f32[16,64], index: 2, kind: input, shape index: {}]   ;;  %s2544_s3 = inlined_call_operand.vmem [shape: f32[64,64], index: 3, kind: input, shape index: {}]   ;;  %s2545_s4 = inlined_call_operand.vmem [shape: f32[64,64], index: 4, kind: input, shape index: {}]   ;;  %s2546_s5 = inlined_call_operand.vmem [shape: f32[64,64], index: 5, kind: input, shape index: {}]   ;;  %s2547_s6 = inlined_call_operand.vmem [shape: f32[1,64], index: 6, kind: input, shape index: {}]   ;;  %s2548_s7 = inlined_call_operand.vmem [shape: f32[1,64], index: 7, kind: input, shape index: {}]   ;;  %s2549_s8 = inlined_call_operand.vmem [shape: f32[1,64], index: 8, kind: input, shape index: {}]   ;;  %s2550_s9 = inlined_call_operand.vmem [shape: f32[64,64], index: 9, kind: input, shape index: {}]   ;;  %s2551_s10 = inlined_call_operand.vmem [shape: f32[1,64], index: 10, kind: input, shape index: {}]   ;;  %s2552_s11 = inlined_call_operand.vmem [shape: f32[16,64], index: 11, kind: output, shape index: {0}]   ;;  %s2553_s12 = inlined_call_operand.hbm [shape: f32[2,8,8], index: 12, kind: output, shape index: {1}]  }
   0x1   :  { %v50_v0 = vld [vmem:[%s2544_s3 + $0x38] sm:$0xff]  ;;  %v49_v2 = vld [vmem:[%s2544_s3 + $0x30] sm:$0xff]  ;;  %v48_v4 = vld [vmem:[%s2544_s3 + $0x28] sm:$0xff] }
   0x2   :  { %v151_v1 = vld [vmem:[%s2545_s4 + $0x38] sm:$0xff]  ;;  %1927 = vmatprep.subr.mxu0 %v50_v0  ;;  %v150_v3 = vld [vmem:[%s2545_s4 + $0x30] sm:$0xff]  ;;  %v149_v5 = vld [vmem:[%s2545_s4 + $0x28] sm:$0xff] }
   0x3   :  { %1946 = vmatprep.subr.mxu1 %v151_v1  ;;  %1928 = vmatpush3.msra.mxu0 %v50_v0  ;;  %v47_v6 = vld [vmem:[%s2544_s3 + $0x20] sm:$0xff]  ;;  %v46_v8 = vld [vmem:[%s2544_s3 + $0x18] sm:$0xff]  ;;  %v45_v10 = vld [vmem:[%s2544_s3 + $0x10] sm:$0xff] }
   0x4   :  { %1947 = vmatpush3.msra.mxu1 %v151_v1  ;;  %1929 = vmatprep.subr.mxu0 %v49_v2  ;;  %v148_v7 = vld [vmem:[%s2545_s4 + $0x20] sm:$0xff]  ;;  %v147_v9 = vld [vmem:[%s2545_s4 + $0x18] sm:$0xff]  ;;  %v146_v11 = vld [vmem:[%s2545_s4 + $0x10] sm:$0xff] }
   0x5   :  { %1948 = vmatprep.subr.mxu1 %v150_v3  ;;  %1930 = vmatpush3.msra.mxu0 %v49_v2 }
   0x6   :  { %1949 = vmatpush3.msra.mxu1 %v150_v3  ;;  %1931 = vmatprep.subr.mxu0 %v48_v4 }
   0x7   :  { %1950 = vmatprep.subr.mxu1 %v149_v5  ;;  %1932 = vmatpush3.msra.mxu0 %v48_v4 }
   0x8   :  { %1951 = vmatpush3.msra.mxu1 %v149_v5  ;;  %1933 = vmatprep.subr.mxu0 %v47_v6 }
   0x9   :  { %1952 = vmatprep.subr.mxu1 %v148_v7  ;;  %1934 = vmatpush3.msra.mxu0 %v47_v6 }
   0xa   :  { %1953 = vmatpush3.msra.mxu1 %v148_v7  ;;  %1935 = vmatprep.subr.mxu0 %v46_v8 }
   0xb   :  { %1954 = vmatprep.subr.mxu1 %v147_v9 }
   0xc   :  { %18 = vsyncpa [#allocation4], 0  ;;  %1936 = vmatpush3.msra.mxu0 %v46_v8  ;;  %1955 = vmatpush3.msra.mxu1 %v147_v9  ;;  %v44_v12 = vld [vmem:[%s2544_s3 + $0x8] sm:$0xff]  ;;  %v43_v14 = vld [vmem:[%s2544_s3] sm:$0xff]  ;;  %vm58_vm0 = vcmask 523264   ;;  %v2148_v30 = vmov 0.0  }
   0xd   :  { %v145_v13 = vld [vmem:[%s2545_s4 + $0x8] sm:$0xff]  ;;  %1937 = vmatprep.subr.mxu0 %v45_v10  ;;  %1956 = vmatprep.subr.mxu1 %v146_v11  ;;  %v144_v15 = vld [vmem:[%s2545_s4] sm:$0xff]  ;;  %v249_v20 = vld [vmem:[%s2546_s5 + $0x38] sm:$0xff]  ;;  %vm2149_vm1 = vmmov 0   ;;  %vm338_vm2 = vcmask 130048   ;;  %vm415_vm3 = vcmask 64512  }
   0xe   :  { %1938 = vmatpush3.msra.mxu0 %v45_v10  ;;  %1957 = vmatpush3.msra.mxu1 %v146_v11  ;;  %v41_v16 = vld [vmem:[%s2541_s0] sm:$0xff]  ;;  %v42_v18 = vld [vmem:[%s2541_s0 + $0x8] sm:$0xff]  ;;  %v248_v21 = vld [vmem:[%s2546_s5 + $0x30] sm:$0xff]  ;;  %s2152_s24 = smov 80   ;;  %s2153_s25 = smov 16   ;;  %vm673_vm4 = vcmask 261248  }
   0xf   :  { %1939 = vmatprep.subr.mxu0 %v44_v12  ;;  %1958 = vmatprep.subr.mxu1 %v145_v13  ;;  %v142_v17 = vld [vmem:[%s2542_s1] sm:$0xff]  ;;  %v143_v19 = vld [vmem:[%s2542_s1 + $0x8] sm:$0xff]  ;;  %v245_v24 = vld [vmem:[%s2546_s5 + $0x18] sm:$0xff]  ;;  %s2154_s0 = smov 32   ;;  %vm845_vm5 = vcmask 392448   ;;  %s2155_s15 = smov 48  }
  0x10   :  { %1940 = vmatpush3.msra.mxu0 %v44_v12  ;;  %1959 = vmatpush3.msra.mxu1 %v145_v13  ;;  %v247_v22 = vld [vmem:[%s2546_s5 + $0x28] sm:$0xff]  ;;  %v246_v23 = vld [vmem:[%s2546_s5 + $0x20] sm:$0xff]  ;;  %v244_v25 = vld [vmem:[%s2546_s5 + $0x10] sm:$0xff]  ;;  %vm1017_vm6 = vcmask 523648  }
  0x11   :  { %1941 = vmatprep.subr.mxu0 %v43_v14  ;;  %1960 = vmatprep.subr.mxu1 %v144_v15  ;;  %v243_v26 = vld [vmem:[%s2546_s5 + $0x8] sm:$0xff]  ;;  %v242_v27 = vld [vmem:[%s2546_s5] sm:$0xff] }
  0x12   :  { %1942 = vmatpush3.msra.mxu0 %v43_v14  ;;  %1943 = vmatprep.mubr.msk.f32.mxu0 %vm58_vm0, %v41_v16  ;;  %v240_v28 = vld [vmem:[%s2543_s2] sm:$0xff]  ;;  %v241_v29 = vld [vmem:[%s2543_s2 + $0x8] sm:$0xff] }
  0x13   :  { %1961 = vmatpush3.msra.mxu1 %v144_v15  ;;  %1962 = vmatprep.mubr.msk.f32.mxu1 %vm58_vm0, %v142_v17  ;;  %v1819_v31 = vld [vmem:[%s2547_s6] ss:$0 sm:$0xff]  ;;  %s2150_s6 = smov 112  }
  0x14   :  { %1944 = vmatmul.mubr.msk.f32.vlgmr.msra.gmra.mxu0 %vm58_vm0, %v42_v18  ;;  %1963 = vmatmul.mubr.msk.f32.vlgmr.msra.gmra.mxu1 %vm58_vm0, %v143_v19  ;;  %v1822_v32 = vld [vmem:[%s2548_s7] ss:$0 sm:$0xff] }
  0x15   :  { %1965 = vmatprep.subr.mxu0 %v249_v20  ;;  %1981 = vmatprep.mubr.msk.f32.mxu0 %vm58_vm0, %v240_v28  ;;  %v1825_v43 = vld [vmem:[%s2549_s8] ss:$0 sm:$0xff]  ;;  %s2151_s8 = smov 96  }
  0x16   :  { %1966 = vmatpush3.msra.mxu0 %v249_v20  ;;  %1984 = vmatprep.subr.mxu1 %v2148_v30 }
  0x17   :  { %1967 = vmatprep.subr.mxu0 %v248_v21  ;;  %1986 = vmatprep.mubr.msk.f32.mxu1 %vm2149_vm1, %v2148_v30 }
  0x18   :  { %1968 = vmatpush3.msra.mxu0 %v248_v21 }
  0x19   :  { %1969 = vmatprep.subr.mxu0 %v247_v22 }
  0x1a   :  { %1970 = vmatpush3.msra.mxu0 %v247_v22 }
  0x1b   :  { %1971 = vmatprep.subr.mxu0 %v246_v23 }
  0x1c   :  { %1972 = vmatpush3.msra.mxu0 %v246_v23 }
  0x1d   :  { %1973 = vmatprep.subr.mxu0 %v245_v24 }
  0x1e   :  { %1974 = vmatpush3.msra.mxu0 %v245_v24 }
  0x1f   :  { %1975 = vmatprep.subr.mxu0 %v244_v25 }
  0x20   :  { %1976 = vmatpush3.msra.mxu0 %v244_v25 }
  0x21   :  { %1977 = vmatprep.subr.mxu0 %v243_v26 }
  0x22   :  { %1978 = vmatpush3.msra.mxu0 %v243_v26 }
  0x23   :  { %1979 = vmatprep.subr.mxu0 %v242_v27 }
  0x24   :  { %1980 = vmatpush3.msra.mxu0 %v242_v27 }
  0x25   :  { %1982 = vmatmul.mubr.msk.f32.vlgmr.msra.gmra.mxu0 %vm58_vm0, %v241_v29  ;;  %2024 = vmatprep.subr.mxu0 %v2148_v30 }
  0x26   :  { %2026 = vmatprep.mubr.msk.f32.mxu0 %vm2149_vm1, %v2148_v30 }
  0xd4   :  { %v1945_v33 = vpop.f32.mrf.mxu0  ;;  %v1964_v34 = vpop.f32.mrf.mxu1 }
  0xd5   :  { %v137_v35 = vadd.f32 %v1945_v33, %v1819_v31  ;;  %v2332_v36 = vadd.f32 %v1964_v34, %v1822_v32 }
  0xd6   :  { %v131_v37 = vpop.f32.mrf.mxu0  ;;  %v231_v38 = vpop.f32.mrf.mxu1 }
  0xd7   :  { %v2334_v39 = vmul.f32 0.25, %v137_v35  ;;  %v132_v40 = vadd.f32 %v1819_v31, %v131_v37  ;;  %v2336_v41 = vadd.f32 %v1822_v32, %v231_v38  ;;  %2025 = vmatpush3.xpose.msk.msra.mxu0 %vm338_vm2, %v2332_v36 }
  0xd8   :  { %2034 = vmatprep.subr.mxu0 %v2148_v30 }
  0xd9   :  { %v2341_v42 = vmul.f32 0.25, %v132_v40  ;;  %504 = vrot.lane.b32.xlu1 %v2336_v41, %s2150_s6  ;;  %1985 = vmatpush3.xpose.msk.msra.mxu1 %vm338_vm2, %v2336_v41 }
  0xda   :  { %2027 = vmatmul.mubr.msk.f32.vlgmr.msra.gmra.mxu0 %vm338_vm2, %v2334_v39  ;;  %1989 = vmatprep.subr.mxu1 %v2148_v30 }
  0xdb   :  { %2036 = vmatprep.mubr.msk.f32.mxu0 %vm2149_vm1, %v2148_v30 }
  0xdc   :  { %1987 = vmatmul.mubr.msk.f32.vlgmr.msra.gmra.mxu1 %vm338_vm2, %v2341_v42 }
  0xdd   :  { %502 = vrot.lane.b32.xlu1 %v2341_v42, %s2150_s6  ;;  %1991 = vmatprep.mubr.msk.f32.mxu1 %vm2149_vm1, %v2148_v30 }
  0xe5   :  { %v1983_v44 = vpop.f32.mrf.mxu0 }
  0xe6   :  { %v2361_v45 = vadd.f32 %v1983_v44, %v1825_v43 }
  0xe7   :  { %v329_v46 = vpop.f32.mrf.mxu0 }
  0xe8   :  { %v2363_v47 = vadd.f32 %v1825_v43, %v329_v46 }
  0xea   :  { %1990 = vmatpush3.msra.mxu1 %v2363_v47 }
  0xeb   :  { %1994 = vmatprep.subr.mxu1 %v2148_v30 }
 0x14b   :  { %v505_v60 = vpop.permute.xlu1 %504 }
 0x14f   :  { %v503_v62 = vpop.permute.xlu1 %502 }
 0x19a   :  { %v2367_v48 = vpop.f32.mrf.mxu0 }
 0x19b   :  { %v1096_v21 = vsel %vm415_vm3, %v2367_v48, -inf }
 0x19c   :  { %v411_v49 = vpop.f32.mrf.mxu1  ;;  %v2028_v50 = vpop.f32.mrf.mxu0 }
 0x19d   :  { %v416_v51 = vsel %vm415_vm3, %v411_v49, -inf }
 0x19e   :  { %417 = vmax.xlane.f32.xlu0 %v416_v51  ;;  %v1988_v52 = vpop.f32.mrf.mxu1 }
 0x227   :  { %v418_v53 = vpop.xlane.xlu0 %417 }
 0x228   :  { %v419_v54 = vsub.f32 %v411_v49, %v418_v53 }
 0x22a   :  { %v420_v55 = vmul.f32 1.442695, %v419_v54 }
 0x22c   :  { %2094 = vpow2.f32 %v420_v55 }
 0x239   :  { %v2095_v56 = vpop.eup %2094 }
 0x23a   :  { %v422_v57 = vsel %vm415_vm3, %v2095_v56, 0.0 }
 0x23b   :  { %423 = vadd.xlane.f32.xlu0 %v422_v57 }
 0x2c4   :  { %v424_v58 = vpop.xlane.xlu0 %423 }
 0x2c5   :  { %2096 = vrcp.f32 %v424_v58 }
 0x2d2   :  { %v2097_v59 = vpop.eup %2096 }
 0x2d3   :  { %v2371_v61 = vmul.f32 %v2097_v59, %v2095_v56 }
 0x2d5   :  { %1992 = vmatmul.mubr.msk.f32.vlgmr.msra.gmra.mxu1 %vm415_vm3, %v2371_v61 }
 0x2d6   :  { %1995 = vmatpush3.xpose.msk.msra.mxu1 %vm338_vm2, %v505_v60  ;;  %1996 = vmatprep.mubr.msk.f32.mxu1 %vm2149_vm1, %v2148_v30 }
 0x2d7   :  { %1999 = vmatprep.subr.mxu1 %v2148_v30 }
 0x2d9   :  { %1997 = vmatmul.mubr.msk.f32.vlgmr.msra.gmra.mxu1 %vm338_vm2, %v503_v62 }
 0x2da   :  { %2001 = vmatprep.mubr.msk.f32.mxu1 %vm2149_vm1, %v2148_v30 }
 0x395   :  { %v497_v63 = vpop.f32.mrf.mxu1 }
 0x396   :  { %501 = vst.msk [vmem:[#allocation2] sm:$0xff] %vm338_vm2, %v497_v63 }
 0x397   :  { %v1993_v0 = vpop.f32.mrf.mxu1 }
 0x399   :  { %v576_v1 = vpop.f32.mrf.mxu1 }
 0x39a   :  { %v580_v2 = vsel %vm415_vm3, %v576_v1, -inf }
 0x39b   :  { %581 = vmax.xlane.f32.xlu0 %v580_v2  ;;  %v1998_v3 = vpop.f32.mrf.mxu1 }
 0x3b1   :  { %593 = vrot.lane.b32.xlu0 %v2363_v47, %s2150_s6 }
 0x3b5   :  { %677 = vrot.lane.b32.xlu0 %v2336_v41, %s2151_s8 }
 0x3b9   :  { %675 = vrot.lane.b32.xlu0 %v2341_v42, %s2151_s8 }
 0x424   :  { %v582_v4 = vpop.xlane.xlu0 %581 }
 0x425   :  { %v583_v5 = vsub.f32 %v576_v1, %v582_v4 }
 0x427   :  { %v584_v6 = vmul.f32 1.442695, %v583_v5 }
 0x428   :  { %v594_v7 = vpop.permute.xlu0 %593 }
 0x429   :  { %2098 = vpow2.f32 %v584_v6  ;;  %2000 = vmatpush3.msra.mxu1 %v594_v7 }
 0x42a   :  { %2004 = vmatprep.subr.mxu1 %v2148_v30 }
 0x42c   :  { %v678_v12 = vpop.permute.xlu0 %677 }
 0x430   :  { %v676_v14 = vpop.permute.xlu0 %675 }
 0x436   :  { %v2099_v8 = vpop.eup %2098 }
 0x437   :  { %v586_v9 = vsel %vm415_vm3, %v2099_v8, 0.0 }
 0x438   :  { %587 = vadd.xlane.f32.xlu1 %v586_v9 }
 0x449   :  { %765 = vrot.lane.b32.xlu1 %v2363_v47, %s2151_s8 }
 0x44d   :  { %849 = vrot.lane.b32.xlu1 %v2336_v41, %s2152_s24 }
 0x451   :  { %847 = vrot.lane.b32.xlu1 %v2341_v42, %s2152_s24 }
 0x455   :  { %1182 = vrot.lane.b32.xlu1 %v2334_v39, %s2150_s6 }
 0x4c1   :  { %v588_v10 = vpop.xlane.xlu1 %587 }
 0x4c2   :  { %2100 = vrcp.f32 %v588_v10 }
 0x4c5   :  { %v766_v15 = vpop.permute.xlu1 %765 }
 0x4c9   :  { %v850_v22 = vpop.permute.xlu1 %849 }
 0x4cd   :  { %v848_v24 = vpop.permute.xlu1 %847 }
 0x4cf   :  { %v2101_v11 = vpop.eup %2100 }
 0x4d0   :  { %v590_v13 = vmul.f32 %v2101_v11, %v2099_v8 }
 0x4d1   :  { %v1183_v28 = vpop.permute.xlu1 %1182 }
 0x4d2   :  { %2002 = vmatmul.mubr.msk.f32.vlgmr.msra.gmra.mxu1 %vm415_vm3, %v590_v13  ;;  %v591_v37 = vadd.f32 %v590_v13, %v2371_v61 }
 0x4d3   :  { %2005 = vmatpush3.xpose.msk.msra.mxu1 %vm338_vm2, %v678_v12  ;;  %2006 = vmatprep.mubr.msk.f32.mxu1 %vm2149_vm1, %v2148_v30 }
 0x4d4   :  { %2009 = vmatprep.subr.mxu1 %v2148_v30 }
 0x4d6   :  { %2007 = vmatmul.mubr.msk.f32.vlgmr.msra.gmra.mxu1 %vm338_vm2, %v676_v14 }
 0x4d7   :  { %2010 = vmatpush3.msra.mxu1 %v766_v15  ;;  %2011 = vmatprep.mubr.msk.f32.mxu1 %vm2149_vm1, %v2148_v30 }
 0x4d8   :  { %2014 = vmatprep.subr.mxu1 %v2148_v30 }
 0x592   :  { %v2409_v16 = vpop.f32.mrf.mxu1 }
 0x594   :  { %v2003_v17 = vpop.f32.mrf.mxu1 }
 0x596   :  { %v749_v18 = vpop.f32.mrf.mxu1 }
 0x597   :  { %v753_v19 = vsel %vm415_vm3, %v749_v18, -inf }
 0x598   :  { %754 = vmax.xlane.f32.xlu0 %v753_v19  ;;  %v2008_v20 = vpop.f32.mrf.mxu1 }
 0x5ae   :  { %1184 = vrot.lane.b32.xlu0 %v2332_v36, %s2150_s6 }
 0x5cd   :  { %1097 = vmax.xlane.f32.xlu0 %v1096_v21 }
 0x621   :  { %v755_v23 = vpop.xlane.xlu0 %754 }
 0x622   :  { %v756_v25 = vsub.f32 %v749_v18, %v755_v23 }
 0x624   :  { %v757_v26 = vmul.f32 1.442695, %v756_v25 }
 0x625   :  { %v1185_v27 = vpop.permute.xlu0 %1184 }
 0x626   :  { %2102 = vpow2.f32 %v757_v26  ;;  %2035 = vmatpush3.xpose.msk.msra.mxu0 %vm338_vm2, %v1185_v27 }
 0x627   :  { %2044 = vmatprep.subr.mxu0 %v2148_v30 }
 0x629   :  { %2037 = vmatmul.mubr.msk.f32.vlgmr.msra.gmra.mxu0 %vm338_vm2, %v1183_v28 }
 0x62a   :  { %2046 = vmatprep.mubr.msk.f32.mxu0 %vm2149_vm1, %v2148_v30 }
 0x633   :  { %v2103_v29 = vpop.eup %2102 }
 0x634   :  { %v759_v31 = vsel %vm415_vm3, %v2103_v29, 0.0 }
 0x635   :  { %760 = vadd.xlane.f32.xlu1 %v759_v31 }
 0x646   :  { %1356 = vrot.lane.b32.xlu1 %v2332_v36, %s2151_s8 }
 0x64a   :  { %1354 = vrot.lane.b32.xlu1 %v2334_v39, %s2151_s8 }
 0x64e   :  { %1527 = vrot.lane.b32.xlu1 %v2332_v36, %s2152_s24 }
 0x652   :  { %1525 = vrot.lane.b32.xlu1 %v2334_v39, %s2152_s24 }
 0x656   :  { %v1098_v44 = vpop.xlane.xlu0 %1097 }
 0x657   :  { %v1099_v46 = vsub.f32 %v2367_v48, %v1098_v44  ;;  %v1706_v44 = vld [vmem:[%s2550_s9 + $0x38] sm:$0xff] }
 0x659   :  { %v1100_v49 = vmul.f32 1.442695, %v1099_v46  ;;  %v1705_v46 = vld [vmem:[%s2550_s9 + $0x30] sm:$0xff] }
 0x6be   :  { %v761_v32 = vpop.xlane.xlu1 %760 }
 0x6bf   :  { %2104 = vrcp.f32 %v761_v32 }
 0x6c0   :  { %2106 = vpow2.f32 %v1100_v49 }
 0x6c2   :  { %v1357_v33 = vpop.permute.xlu1 %1356 }
 0x6c3   :  { %2045 = vmatpush3.xpose.msk.msra.mxu0 %vm338_vm2, %v1357_v33 }
 0x6c4   :  { %2054 = vmatprep.subr.mxu0 %v2148_v30 }
 0x6c6   :  { %v1355_v34 = vpop.permute.xlu1 %1354 }
 0x6c7   :  { %2047 = vmatmul.mubr.msk.f32.vlgmr.msra.gmra.mxu0 %vm338_vm2, %v1355_v34 }
 0x6c8   :  { %2056 = vmatprep.mubr.msk.f32.mxu0 %vm2149_vm1, %v2148_v30 }
 0x6ca   :  { %v1528_v35 = vpop.permute.xlu1 %1527 }
 0x6cb   :  { %2055 = vmatpush3.xpose.msk.msra.mxu0 %vm338_vm2, %v1528_v35 }
 0x6cc   :  { %v2105_v36 = vpop.eup %2104  ;;  %2064 = vmatprep.subr.mxu0 %v1706_v44 }
 0x6cd   :  { %v763_v38 = vmul.f32 %v2105_v36, %v2103_v29  ;;  %v2451_v58 = vpop.eup %2106 }
 0x6ce   :  { %v1526_v39 = vpop.permute.xlu1 %1525  ;;  %v1102_v48 = vsel %vm415_vm3, %v2451_v58, 0.0 }
 0x6cf   :  { %2012 = vmatmul.mubr.msk.f32.vlgmr.msra.gmra.mxu1 %vm415_vm3, %v763_v38  ;;  %2057 = vmatmul.mubr.msk.f32.vlgmr.msra.gmra.mxu0 %vm338_vm2, %v1526_v39  ;;  %v2439_v40 = vadd.f32 %v763_v38, %v591_v37 }
 0x6d0   :  { %2015 = vmatpush3.xpose.msk.msra.mxu1 %vm338_vm2, %v850_v22  ;;  %2016 = vmatprep.mubr.msk.f32.mxu1 %vm2149_vm1, %v2148_v30 }
 0x6d1   :  { %2019 = vmatprep.subr.mxu1 %v2148_v30  ;;  %2065 = vmatpush3.msra.mxu0 %v1706_v44 }
 0x6d2   :  { %2066 = vmatprep.subr.mxu0 %v1705_v46 }
 0x6d3   :  { %2017 = vmatmul.mubr.msk.f32.vlgmr.msra.gmra.mxu1 %vm338_vm2, %v848_v24  ;;  %2067 = vmatpush3.msra.mxu0 %v1705_v46 }
 0x6d4   :  { %2021 = vmatprep.mubr.msk.f32.mxu1 %vm2149_vm1, %v2148_v30 }
 0x6e9   :  { %v1256_v41 = vpop.f32.mrf.mxu0 }
 0x6ea   :  { %v1260_v42 = vsel %vm415_vm3, %v1256_v41, -inf }
 0x6eb   :  { %1261 = vmax.xlane.f32.xlu0 %v1260_v42  ;;  %v2038_v43 = vpop.f32.mrf.mxu0 }
 0x774   :  { %v1262_v50 = vpop.xlane.xlu0 %1261 }
 0x775   :  { %v1263_v51 = vsub.f32 %v1256_v41, %v1262_v50  ;;  %v1704_v50 = vld [vmem:[%s2550_s9 + $0x28] sm:$0xff] }
 0x776   :  { %2068 = vmatprep.subr.mxu0 %v1704_v50 }
 0x777   :  { %v1264_v53 = vmul.f32 1.442695, %v1263_v51  ;;  %2069 = vmatpush3.msra.mxu0 %v1704_v50 }
 0x779   :  { %2108 = vpow2.f32 %v1264_v53  ;;  %v1702_v53 = vld [vmem:[%s2550_s9 + $0x18] sm:$0xff] }
 0x786   :  { %v2109_v1 = vpop.eup %2108 }
 0x787   :  { %v1428_v52 = vpop.f32.mrf.mxu0  ;;  %v1266_v2 = vsel %vm415_vm3, %v2109_v1, 0.0 }
 0x788   :  { %v1432_v0 = vsel %vm415_vm3, %v1428_v52, -inf }
 0x789   :  { %v2048_v54 = vpop.f32.mrf.mxu0 }
 0x78a   :  { %v1701_v54 = vld [vmem:[%s2550_s9 + $0x10] sm:$0xff] }
 0x78f   :  { %v837_v55 = vpop.f32.mrf.mxu1  ;;  %v1599_v56 = vpop.f32.mrf.mxu0 }
 0x790   :  { %v1603_v57 = vsel %vm415_vm3, %v1599_v56, -inf }
 0x791   :  { %1604 = vmax.xlane.f32.xlu0 %v1603_v57  ;;  %v2013_v59 = vpop.f32.mrf.mxu1  ;;  %v2058_v60 = vpop.f32.mrf.mxu0 }
 0x793   :  { %v921_v61 = vpop.f32.mrf.mxu1 }
 0x794   :  { %v925_v62 = vsel %vm415_vm3, %v921_v61, -inf }
 0x795   :  { %1103 = vadd.xlane.f32.xlu0 %v1102_v48  ;;  %926 = vmax.xlane.f32.xlu1 %v925_v62  ;;  %v2018_v63 = vpop.f32.mrf.mxu1 }
 0x799   :  { %1433 = vmax.xlane.f32.xlu1 %v1432_v0 }
 0x79d   :  { %1267 = vadd.xlane.f32.xlu1 %v1266_v2 }
 0x81a   :  { %v1605_v3 = vpop.xlane.xlu0 %1604 }
 0x81b   :  { %v1606_v4 = vsub.f32 %v1599_v56, %v1605_v3  ;;  %v1700_v56 = vld [vmem:[%s2550_s9 + $0x8] sm:$0xff] }
 0x81d   :  { %v1607_v5 = vmul.f32 1.442695, %v1606_v4 }
 0x81e   :  { %v927_v6 = vpop.xlane.xlu1 %926  ;;  %v1104_v21 = vpop.xlane.xlu0 %1103 }
 0x81f   :  { %2110 = vpow2.f32 %v1607_v5  ;;  %v928_v7 = vsub.f32 %v921_v61, %v927_v6 }
 0x821   :  { %v929_v8 = vmul.f32 1.442695, %v928_v7 }
 0x822   :  { %v1434_v9 = vpop.xlane.xlu1 %1433 }
 0x823   :  { %2112 = vpow2.f32 %v929_v8  ;;  %v1435_v10 = vsub.f32 %v1428_v52, %v1434_v9 }
 0x825   :  { %v1436_v11 = vmul.f32 1.442695, %v1435_v10 }
 0x826   :  { %v1268_v19 = vpop.xlane.xlu1 %1267 }
 0x827   :  { %2114 = vpow2.f32 %v1436_v11 }
 0x828   :  { %2116 = vrcp.f32 %v1268_v19 }
 0x829   :  { %2118 = vrcp.f32 %v1104_v21 }
 0x82c   :  { %v2111_v12 = vpop.eup %2110 }
 0x82d   :  { %v1609_v13 = vsel %vm415_vm3, %v2111_v12, 0.0 }
 0x82e   :  { %1610 = vadd.xlane.f32.xlu1 %v1609_v13 }
 0x830   :  { %v2113_v14 = vpop.eup %2112 }
 0x831   :  { %v931_v15 = vsel %vm415_vm3, %v2113_v14, 0.0 }
 0x832   :  { %932 = vadd.xlane.f32.xlu1 %v931_v15 }
 0x834   :  { %v2115_v17 = vpop.eup %2114 }
 0x835   :  { %v1438_v18 = vsel %vm415_vm3, %v2115_v17, 0.0 }
 0x836   :  { %1439 = vadd.xlane.f32.xlu0 %v1438_v18 }
 0x843   :  { %1273 = vrot.lane.b32.xlu1 %v2361_v45, %s2150_s6 }
 0x847   :  { %1444 = vrot.lane.b32.xlu1 %v2361_v45, %s2151_s8 }
 0x84b   :  { %670 = vrot.lane.b32.xlu1 %v2409_v16, %s2153_s25 }
 0x84c   :  { %937 = vrot.lane.b32.xlu0 %v2363_v47, %s2152_s24  ;;  %v2117_v47 = vpop.eup %2116 }
 0x84d   :  { %v2119_v28 = vpop.eup %2118  ;;  %v1270_v32 = vmul.f32 %v2117_v47, %v2109_v1 }
 0x84e   :  { %v1106_v35 = vmul.f32 %v2119_v28, %v2451_v58  ;;  %v1699_v58 = vld [vmem:[%s2550_s9] sm:$0xff] }
 0x850   :  { %1615 = vrot.lane.b32.xlu0 %v2361_v45, %s2152_s24  ;;  %v1271_v38 = vadd.f32 %v1270_v32, %v1106_v35 }
 0x854   :  { %842 = vrot.lane.b32.xlu0 %v837_v55, %s2154_s0 }
 0x8b7   :  { %v1611_v20 = vpop.xlane.xlu1 %1610 }
 0x8bb   :  { %v933_v22 = vpop.xlane.xlu1 %932 }
 0x8bc   :  { %2120 = vrcp.f32 %v933_v22 }
 0x8bd   :  { %2122 = vrcp.f32 %v1611_v20 }
 0x8bf   :  { %v1440_v23 = vpop.xlane.xlu0 %1439  ;;  %v1274_v24 = vpop.permute.xlu1 %1273 }
 0x8c0   :  { %2124 = vrcp.f32 %v1440_v23 }
 0x8c3   :  { %v938_v16 = vpop.permute.xlu0 %937  ;;  %v1445_v25 = vpop.permute.xlu1 %1444 }
 0x8c4   :  { %2020 = vmatpush3.msra.mxu1 %v938_v16 }
 0x8c5   :  { %2029 = vmatprep.subr.mxu1 %v2148_v30 }
 0x8c7   :  { %v1616_v26 = vpop.permute.xlu0 %1615  ;;  %v671_v27 = vpop.permute.xlu1 %670 }
 0x8c8   :  { %674 = vst.msk [vmem:[#allocation2] sm:$0xff] %vm673_vm4, %v671_v27 }
 0x8c9   :  { %v2121_v29 = vpop.eup %2120 }
 0x8ca   :  { %v935_v31 = vmul.f32 %v2121_v29, %v2113_v14  ;;  %v2123_v34 = vpop.eup %2122 }
 0x8cb   :  { %v843_v33 = vpop.permute.xlu0 %842  ;;  %v1613_v42 = vmul.f32 %v2123_v34, %v2111_v12 }
 0x8cc   :  { %846 = vst.msk [vmem:[#allocation2] sm:$0xff] %vm845_vm5, %v843_v33  ;;  %2022 = vmatmul.mubr.msk.f32.vlgmr.msra.gmra.mxu1 %vm415_vm3, %v935_v31  ;;  %v936_v36 = vadd.f32 %v935_v31, %v2439_v40 }
 0x8cd   :  { %v2125_v37 = vpop.eup %2124  ;;  %2030 = vmatpush3.msra.mxu1 %v2361_v45  ;;  %2031 = vmatprep.mubr.msk.f32.mxu1 %vm2149_vm1, %v2148_v30 }
 0x8ce   :  { %2039 = vmatprep.subr.mxu1 %v2148_v30  ;;  %v1442_v39 = vmul.f32 %v2125_v37, %v2115_v17  ;;  %v1019_v41 = vmul.f32 0.25, %v936_v36 }
 0x8d0   :  { %2032 = vmatmul.mubr.msk.f32.vlgmr.msra.gmra.mxu1 %vm415_vm3, %v1106_v35  ;;  %v1443_v43 = vadd.f32 %v1442_v39, %v1271_v38  ;;  %1797 = vst.msk [vmem:[#allocation3] sm:$0xff] %vm415_vm3, %v1019_v41 }
 0x8d1   :  { %2040 = vmatpush3.msra.mxu1 %v1274_v24  ;;  %2041 = vmatprep.mubr.msk.f32.mxu1 %vm2149_vm1, %v2148_v30 }
 0x8d2   :  { %2049 = vmatprep.subr.mxu1 %v2148_v30  ;;  %v1614_v45 = vadd.f32 %v1613_v42, %v1443_v43 }
 0x8d4   :  { %2042 = vmatmul.mubr.msk.f32.vlgmr.msra.gmra.mxu1 %vm415_vm3, %v1270_v32  ;;  %v1696_v40 = vmul.f32 0.25, %v1614_v45 }
 0x8d5   :  { %2050 = vmatpush3.msra.mxu1 %v1445_v25  ;;  %2051 = vmatprep.mubr.msk.f32.mxu1 %vm2149_vm1, %v2148_v30 }
 0x8d6   :  { %2059 = vmatprep.subr.mxu1 %v2148_v30  ;;  %1798 = vst.msk [vmem:[#allocation3 + $0x8] sm:$0xff] %vm415_vm3, %v1696_v40 }
 0x8d8   :  { %2052 = vmatmul.mubr.msk.f32.vlgmr.msra.gmra.mxu1 %vm415_vm3, %v1442_v39 }
 0x8d9   :  { %2060 = vmatpush3.msra.mxu1 %v1616_v26  ;;  %2061 = vmatprep.mubr.msk.f32.mxu1 %vm2149_vm1, %v2148_v30  ;;  %v1703_v30 = vld [vmem:[%s2550_s9 + $0x20] sm:$0xff]  ;;  %s2156_s9 = smov [#allocation3]  }
 0x8da   :  { %2070 = vmatprep.subr.mxu0 %v1703_v30  ;;  %s1806_s4 = sshll.u32 %s2156_s9, 4  ;;  %s1807_s4 = int_to_ptr.vmem [resolvable:$true] %s1806_s4 }
 0x8db   :  { %2071 = vmatpush3.msra.mxu0 %v1703_v30  ;;  %s2126_s22 = scalar_lea.vmem %s1807_s4, 256  ;;  %p2131_p1 = scmp.lt.s32.totalorder %s1807_s4, %s1807_s4 }
 0x8dc   :  { %2062 = vmatmul.mubr.msk.f32.vlgmr.msra.gmra.mxu1 %vm415_vm3, %v1613_v42  ;;  %2072 = vmatprep.subr.mxu0 %v1702_v53  ;;  %p2127_p0 = scmp.ne.s32.totalorder %s1807_s4, %s2126_s22  ;;  %p2132_p2 = scmp.lt.s32.totalorder %s2126_s22, %s2126_s22 }
 0x8dd   :  { %2073 = vmatpush3.msra.mxu0 %v1702_v53 }
 0x8de   :  { %2074 = vmatprep.subr.mxu0 %v1701_v54  ;;  %p2133_p3 = por %p2132_p2, %p2131_p1 }
 0x8df   :  { %2075 = vmatpush3.msra.mxu0 %v1701_v54 }
 0x8e0   :  { %2076 = vmatprep.subr.mxu0 %v1700_v56  ;;  %p2134_p4 = pnand %p2133_p3, %p2127_p0 }
 0x8e1   :  { %2077 = vmatpush3.msra.mxu0 %v1700_v56 }
 0x8e2   :  { %2078 = vmatprep.subr.mxu0 %v1699_v58 }
 0x8e3   :  { %2079 = vmatpush3.msra.mxu0 %v1699_v58 }
 0x98c   :  { %v1009_v49 = vpop.f32.mrf.mxu1 }
 0x98d   :  { %1014 = vrot.lane.b32.xlu0 %v1009_v49, %s2155_s15 }
 0x98e   :  { %v2023_v51 = vpop.f32.mrf.mxu1 }
 0x990   :  { %v1177_v52 = vpop.f32.mrf.mxu1 }
 0x991   :  { %1181 = vst.msk [vmem:[#allocation2 + $0x8] sm:$0xff] %vm338_vm2, %v1177_v52 }
 0x992   :  { %v2033_v55 = vpop.f32.mrf.mxu1 }
 0x994   :  { %v1345_v57 = vpop.f32.mrf.mxu1 }
 0x995   :  { %1350 = vrot.lane.b32.xlu1 %v1345_v57, %s2153_s25 }
 0x996   :  { %v2043_v59 = vpop.f32.mrf.mxu1 }
 0x998   :  { %v1516_v60 = vpop.f32.mrf.mxu1 }
 0x999   :  { %1521 = vrot.lane.b32.xlu1 %v1516_v60, %s2154_s0 }
 0x99a   :  { %v2053_v61 = vpop.f32.mrf.mxu1 }
 0x99c   :  { %v1687_v48 = vpop.f32.mrf.mxu1 }
 0x99d   :  { %1692 = vrot.lane.b32.xlu0 %v1687_v48, %s2155_s15 }
 0x99e   :  { %v2063_v62 = vpop.f32.mrf.mxu1 }
 0x9ff   :  { %v1015_v63 = vpop.permute.xlu0 %1014 }
 0xa00   :  { %1018 = vst.msk [vmem:[#allocation2] sm:$0xff] %vm1017_vm6, %v1015_v63 }
 0xa07   :  { %v1351_v0 = vpop.permute.xlu1 %1350  ;;  %v1697_v1 = vld [vmem:[#allocation2] sm:$0xff] }
 0xa08   :  { %1353 = vst.msk [vmem:[#allocation2 + $0x8] sm:$0xff] %vm673_vm4, %v1351_v0  ;;  %2080 = vmatprep.mubr.msk.f32.mxu0 %vm58_vm0, %v1697_v1 }
 0xa0b   :  { %v1522_v2 = vpop.permute.xlu1 %1521 }
 0xa0c   :  { %1524 = vst.msk [vmem:[#allocation2 + $0x8] sm:$0xff] %vm845_vm5, %v1522_v2 }
 0xa0f   :  { %v1693_v3 = vpop.permute.xlu0 %1692 }
 0xa10   :  { %1695 = vst.msk [vmem:[#allocation2 + $0x8] sm:$0xff] %vm1017_vm6, %v1693_v3 }
 0xa17   :  { %v1698_v4 = vld [vmem:[#allocation2 + $0x8] sm:$0xff] }
 0xa18   :  { %2081 = vmatmul.mubr.msk.f32.vlgmr.msra.gmra.mxu0 %vm58_vm0, %v1698_v4 }
 0xa19   :  { %2137 = shalt.err (!%p2134_p4)
}
 0xa1a   :  { %s2157_s2 = smov 128   ;;  %s2158_s6 = smov 8   ;;  %v1852_v5 = vld [vmem:[%s2551_s10] ss:$0 sm:$0xff] }
 0xa1b   :  { %1812 = dma.vmem_to_hbm [thread:$0]  %s1807_s4, 256, %s2553_s12, [#allocation4], %s2157_s2, %s2157_s2, %s2158_s6  }
 0xad8   :  { %v2082_v6 = vpop.f32.mrf.mxu0 }
 0xad9   :  { %v1792_v7 = vadd.f32 %v2082_v6, %v1852_v5 }
 0xada   :  { %v1786_v8 = vpop.f32.mrf.mxu0 }
 0xadb   :  { %1796 = vst.msk [vmem:[%s2552_s11 + $0x8] sm:$0xff] %vm58_vm0, %v1792_v7  ;;  %v1787_v9 = vadd.f32 %v1852_v5, %v1786_v8 }
 0xadd   :  { %1795 = vst.msk [vmem:[%s2552_s11] sm:$0xff] %vm58_vm0, %v1787_v9 }
 0xade   :  { %2146 = dma.done.wait [#allocation4], 256  }
 0xadf   :  { %2147 = vsyncadd [#allocation4], 4294967040 }
 0xae0   :  { %1818 = vsyncpa [#allocation4], 1 }

</bundles_post_ra>
